<compile_context>
chip_gen: v7x
topology: tpu7x:2x2x1
jax: 0.10.0
libtpu: 0.0.40
codegen_flags: <defaults>
</compile_context>

<pallas_src>
import math
from functools import partial

import numpy as np
import jax
import jax.numpy as jnp
from jax.experimental import pallas as pl
from jax.experimental.pallas import tpu as pltpu


_LC = 128  # lane-chunk width for the kj-interleave (dilation) matmul


def _dilation_matrix(dtype):
    """D [2*LC, 2*LC]: rows [0,LC) scatter to even lanes, rows [LC,2LC) to odd."""
    d = np.zeros((2 * _LC, 2 * _LC), np.float32)
    idx = np.arange(_LC)
    d[idx, 2 * idx] = 1.0
    d[_LC + idx, 2 * idx + 1] = 1.0
    return jnp.asarray(d, dtype=dtype)


def _pick_row_tile(h, w, cin, cout, itemsize, n_batch):
    """Input rows per grid step.  (rows*w) % 128 == 0, or rows == h (full image).

    Sized from a conservative VMEM budget (valid for v5e/v6e 128 MiB and v7x
    64 MiB) that accounts for double-buffered x/out blocks, the f32/bf16
    intermediates and the grid-invariant weight/bias/dilation buffers.
    """
    m = 128 // math.gcd(128, w)
    if m > h:
        return h  # the full image is the only legal (lane-dense) tile

    per_row = 2 * (cin * w + 4 * cout * w) * itemsize      # double-buffered blocks
    per_row += 4 * cout * w * 4                            # z (f32)
    per_row += 2 * cout * 2 * w * (itemsize + 4)           # U chunks (+ f32 temp)
    per_row += cin * w * itemsize                          # x value copy

    budget = 24 * 1024 * 1024
    fixed = 2 * (4 * cout * cin + (2 * _LC) * (2 * _LC)) * itemsize
    fixed += 2 * 4 * cout * 128 * 4                        # bias block (lane-padded)
    avail = max(budget - fixed, per_row * m)

    rows = int(avail // per_row)
    rows = max(m, (rows // m) * m)
    rows = min(rows, max(m, 64), h)        # cap unrolled in-kernel loops
    rows = max(m, (rows // m) * m)

    # Prefer a tile that divides h (avoids a ragged/masked tail block).
    t = rows
    while t > m and h % t:
        t -= m
    if h % t == 0:
        rows = t

    # Guarantee >= 2 total grid steps so both v7x TensorCores get work.
    if n_batch * (-(-h // rows)) < 2 and rows > m:
        rows = max(m, (rows // 2) // m * m)
    return rows


def _make_kernel(rows, w_cols, mask_tail, h_total):
    lanes = rows * w_cols
    two_w = 2 * w_cols

    def kernel(x_ref, w_ref, d_ref, b_ref, o_ref):
        # x_ref: (Cin, rows*W)     native-NCHW input rows, spatial on lanes
        # w_ref: (4*Cout, Cin)     rows ordered (kj, ki, co)
        # d_ref: (256, 256)        0/1 lane-dilation matrix (kj interleave, MXU)
        # b_ref: (4*Cout, 1)       bias (f32)
        # o_ref: (Cout, 4*rows*W)  2*rows output rows, NCHW-contiguous, lane-dense
        x = x_ref[...]
        if mask_tail:
            # Ragged tail row-block: zero the out-of-range lanes so garbage /
            # NaNs cannot leak into valid lanes through the dilation matmul.
            r_blk = pl.program_id(1)
            valid = jnp.minimum(rows, h_total - r_blk * rows) * w_cols
            lane = jax.lax.broadcasted_iota(jnp.int32, x.shape, 1)
            x = jnp.where(lane < valid, x, 0)

        z = jnp.dot(w_ref[...], x, preferred_element_type=jnp.float32)
        z = (z + b_ref[...]).astype(o_ref.dtype)            # (4Cout, L)
        c2 = z.shape[0] // 2
        a, b = z[:c2], z[c2:]                                # kj=0 / kj=1 slabs
        dmat = d_ref[...]

        # ---- kj (output-column) interleave: chunked 0/1 matmuls on the MXU ----
        pieces = []
        c0 = 0
        while c0 < lanes:
            wc = min(_LC, lanes - c0)
            a_c = a[:, c0:c0 + wc]
            b_c = b[:, c0:c0 + wc]
            if wc == _LC:
                u_c = jnp.dot(jnp.concatenate([a_c, b_c], axis=-1), dmat,
                              preferred_element_type=jnp.float32)
            else:  # ragged tail chunk (only when the whole image is one block)
                u_c = (jnp.dot(a_c, dmat[0:wc, 0:2 * wc],
                               preferred_element_type=jnp.float32) +
                       jnp.dot(b_c, dmat[_LC:_LC + wc, 0:2 * wc],
                               preferred_element_type=jnp.float32))
            pieces.append(u_c.astype(o_ref.dtype))
            c0 += wc
        u = pieces[0] if len(pieces) == 1 else jnp.concatenate(pieces, axis=-1)
        cout = c2 // 2
        u0, u1 = u[:cout], u[cout:]                          # ki=0 / ki=1 rows

        # ---- ki (output-row) interleave: place row pairs via static slices ----
        for r in range(rows):
            src = r * two_w
            dst = 2 * src
            o_ref[:, dst:dst + two_w] = u0[:, src:src + two_w]
            o_ref[:, dst + two_w:dst + 2 * two_w] = u1[:, src:src + two_w]

    return kernel


@partial(jax.jit, static_argnames=("compute_dtype",))
def _upsample_core(x_nchw, w_flat, b_col, compute_dtype=jnp.bfloat16):
    n, cin, h, w = x_nchw.shape
    c4 = w_flat.shape[0]
    cout = c4 // 4
    hw = h * w
    itemsize = jnp.dtype(compute_dtype).itemsize

    x3 = x_nchw.reshape(n, cin, hw).astype(compute_dtype)    # free NCHW reshape
    w_flat = w_flat.astype(compute_dtype)
    dil = _dilation_matrix(compute_dtype)

    th = _pick_row_tile(h, w, cin, cout, itemsize, n)
    lanes = th * w
    num_row_blocks = -(-h // th)
    kernel = _make_kernel(th, w, (h % th) != 0, h)

    cost = pl.CostEstimate(
        flops=2 * n * hw * cin * c4 + 2 * n * (2 * hw) * (2 * _LC) * (2 * cout),
        transcendentals=0,
        bytes_accessed=(n * cin * hw + n * cout * 4 * hw + c4 * cin) * itemsize,
    )

    out = pl.pallas_call(
        kernel,
        out_shape=jax.ShapeDtypeStruct((n, cout, 4 * hw), compute_dtype),
        grid_spec=pltpu.PrefetchScalarGridSpec(
            num_scalar_prefetch=0,
            grid=(n, num_row_blocks),
            in_specs=[
                pl.BlockSpec((pl.Squeezed(), cin, lanes), lambda b, r: (b, 0, r)),
                pl.BlockSpec((c4, cin), lambda b, r: (0, 0)),
                pl.BlockSpec((2 * _LC, 2 * _LC), lambda b, r: (0, 0)),
                pl.BlockSpec((c4, 1), lambda b, r: (0, 0)),
            ],
            out_specs=pl.BlockSpec((pl.Squeezed(), cout, 4 * lanes),
                                   lambda b, r: (b, 0, r)),
        ),
        compiler_params=pltpu.CompilerParams(
            dimension_semantics=("parallel", "parallel"),
            vmem_limit_bytes=48 * 1024 * 1024,
        ),
        cost_estimate=cost,
    )(x3, w_flat, dil, b_col)

    # Output is already NCHW-contiguous: this reshape is free (no data movement).
    return out.reshape(n, cout, 2 * h, 2 * w)


def upsample_transposed_conv(x_nchw, weight, bias, *, compute_dtype=jnp.bfloat16):
    """ConvTranspose2d(kernel_size=2, stride=2): [N,Cin,H,W] -> [N,Cout,2H,2W].

    weight: [Cin, Cout, 2, 2] (PyTorch ConvTranspose2d layout), bias: [Cout].
    """
    cin, cout = weight.shape[0], weight.shape[1]
    assert weight.shape[2] == 2 and weight.shape[3] == 2
    assert x_nchw.shape[1] == cin
    w_flat = jnp.transpose(weight, (3, 2, 1, 0)).reshape(4 * cout, cin)
    b_col = jnp.tile(bias, 4).reshape(4 * cout, 1).astype(jnp.float32)
    return _upsample_core(x_nchw, w_flat.astype(compute_dtype), b_col,
                          compute_dtype=compute_dtype)


class UpSamplePallas:
    """UpSample(in_channels, out_channels, sample_resnet=False) forward pass."""
    # TODO(synk): sample_resnet=True branch (ResidualBlock) not implemented; its
    # definition is not part of the provided module.

    def __init__(self, in_channels, out_channels, key, compute_dtype=jnp.bfloat16):
        kw, kb = jax.random.split(key)
        bound = 1.0 / math.sqrt(in_channels * 2 * 2)
        self.weight = jax.random.uniform(
            kw, (in_channels, out_channels, 2, 2), jnp.float32, -bound, bound)
        self.bias = jax.random.uniform(
            kb, (out_channels,), jnp.float32, -bound, bound)
        self.compute_dtype = compute_dtype
        # Kernel-layout parameters, prepared once (hoisted off the per-call path).
        self.w_flat = jnp.transpose(self.weight, (3, 2, 1, 0)).reshape(
            4 * out_channels, in_channels).astype(compute_dtype)
        self.b_col = jnp.tile(self.bias, 4).reshape(4 * out_channels, 1).astype(jnp.float32)

    def __call__(self, x_nchw):
        return _upsample_core(x_nchw, self.w_flat, self.b_col,
                              compute_dtype=self.compute_dtype)


if __name__ == "__main__":
    key = jax.random.PRNGKey(0)
    k_x, k_p = jax.random.split(key)

    N, Cin, Cout, H, W = 2, 4, 8, 16, 16
    x = jax.random.normal(k_x, (N, Cin, H, W), jnp.float32)

    module = UpSamplePallas(Cin, Cout, k_p)
    y = jax.block_until_ready(module(x))
    assert y.shape == (N, Cout, 2 * H, 2 * W), y.shape

    # Independent reference of the k=2, s=2 transposed conv (f32).
    ref = jnp.einsum('ncij,cokl->noikjl', x, module.weight)
    ref = ref + module.bias[None, :, None, None, None, None]
    ref = ref.reshape(N, Cout, 2 * H, 2 * W)
    assert jnp.allclose(y.astype(jnp.float32), ref, atol=8e-2, rtol=5e-2)

    # Batch-1 call exercises the ">= 2 grid steps" tile split (different tiling).
    y1 = jax.block_until_ready(module(x[:1]))
    assert jnp.allclose(y1.astype(jnp.float32), ref[:1], atol=8e-2, rtol=5e-2)

    print("KERNEL_OK")
</pallas_src>

<mosaic_0001>
module attributes {stable_mosaic.version = 11 : i64} {
  func.func @kernel(%arg0: i32, %arg1: i32, %arg2: memref<1x4x256xbf16, #tpu.memory_space<vmem>>, %arg3: memref<32x4xbf16, #tpu.memory_space<vmem>>, %arg4: memref<256x256xbf16, #tpu.memory_space<vmem>>, %arg5: memref<32x1xf32, #tpu.memory_space<vmem>>, %arg6: memref<1x8x1024xbf16, #tpu.memory_space<vmem>>) attributes {dimension_semantics = [#tpu.dimension_semantics<parallel>, #tpu.dimension_semantics<parallel>], iteration_bounds = array<i64: 2, 1>, scalar_prefetch = 0 : i64, scratch_operands = 0 : i64, tpu.core_type = #tpu.core_type<tc>, window_params = [{transform_indices = @transform_0, window_bounds = array<i64: 1, 4, 256>}, {pipeline_mode = #tpu.pipeline_mode<synchronous>, transform_indices = @transform_1, window_bounds = array<i64: 32, 4>}, {pipeline_mode = #tpu.pipeline_mode<synchronous>, transform_indices = @transform_2, window_bounds = array<i64: 256, 256>}, {pipeline_mode = #tpu.pipeline_mode<synchronous>, transform_indices = @transform_3, window_bounds = array<i64: 32, 1>}, {transform_indices = @transform_4, window_bounds = array<i64: 1, 8, 1024>}]} {
    %c0 = arith.constant 0 : index
    %c0_0 = arith.constant 0 : index
    %c0_1 = arith.constant 0 : index
    %0 = vector.load %arg2[%c0, %c0_0, %c0_1] : memref<1x4x256xbf16, #tpu.memory_space<vmem>>, vector<1x4x256xbf16>
    %1 = vector.shape_cast %0 : vector<1x4x256xbf16> to vector<4x256xbf16>
    %c0_2 = arith.constant 0 : index
    %c0_3 = arith.constant 0 : index
    %2 = vector.load %arg3[%c0_2, %c0_3] : memref<32x4xbf16, #tpu.memory_space<vmem>>, vector<32x4xbf16>
    %cst = arith.constant dense<0.000000e+00> : vector<32x256xf32>
    %3 = tpu.matmul %2, %1, %cst {dimension_numbers = #tpu.dot_dimension_numbers<[1], [0], [0], [1], [0, 0, 1, 1], [], []>} : vector<32x4xbf16>, vector<4x256xbf16>, vector<32x256xf32> -> vector<32x256xf32>
    %c0_4 = arith.constant 0 : index
    %c0_5 = arith.constant 0 : index
    %4 = vector.load %arg5[%c0_4, %c0_5] : memref<32x1xf32, #tpu.memory_space<vmem>>, vector<32x1xf32>
    %5 = vector.broadcast %4 : vector<32x1xf32> to vector<32x256xf32>
    %6 = arith.addf %3, %5 : vector<32x256xf32>
    %7 = arith.truncf %6 : vector<32x256xf32> to vector<32x256xbf16>
    %8 = vector.extract_strided_slice %7 {offsets = [0, 0], sizes = [16, 256], strides = [1, 1]} : vector<32x256xbf16> to vector<16x256xbf16>
    %9 = vector.extract_strided_slice %7 {offsets = [16, 0], sizes = [16, 256], strides = [1, 1]} : vector<32x256xbf16> to vector<16x256xbf16>
    %c0_6 = arith.constant 0 : index
    %c0_7 = arith.constant 0 : index
    %10 = vector.load %arg4[%c0_6, %c0_7] : memref<256x256xbf16, #tpu.memory_space<vmem>>, vector<256x256xbf16>
    %11 = vector.extract_strided_slice %8 {offsets = [0, 0], sizes = [16, 128], strides = [1, 1]} : vector<16x256xbf16> to vector<16x128xbf16>
    %12 = vector.extract_strided_slice %9 {offsets = [0, 0], sizes = [16, 128], strides = [1, 1]} : vector<16x256xbf16> to vector<16x128xbf16>
    %13 = tpu.concatenate %11, %12 in 1 : vector<16x128xbf16>, vector<16x128xbf16> -> vector<16x256xbf16>
    %cst_8 = arith.constant dense<0.000000e+00> : vector<16x256xf32>
    %14 = tpu.matmul %13, %10, %cst_8 {dimension_numbers = #tpu.dot_dimension_numbers<[1], [0], [0], [1], [0, 0, 1, 1], [], []>} : vector<16x256xbf16>, vector<256x256xbf16>, vector<16x256xf32> -> vector<16x256xf32>
    %15 = arith.truncf %14 : vector<16x256xf32> to vector<16x256xbf16>
    %16 = vector.extract_strided_slice %8 {offsets = [0, 128], sizes = [16, 128], strides = [1, 1]} : vector<16x256xbf16> to vector<16x128xbf16>
    %17 = vector.extract_strided_slice %9 {offsets = [0, 128], sizes = [16, 128], strides = [1, 1]} : vector<16x256xbf16> to vector<16x128xbf16>
    %18 = tpu.concatenate %16, %17 in 1 : vector<16x128xbf16>, vector<16x128xbf16> -> vector<16x256xbf16>
    %cst_9 = arith.constant dense<0.000000e+00> : vector<16x256xf32>
    %19 = tpu.matmul %18, %10, %cst_9 {dimension_numbers = #tpu.dot_dimension_numbers<[1], [0], [0], [1], [0, 0, 1, 1], [], []>} : vector<16x256xbf16>, vector<256x256xbf16>, vector<16x256xf32> -> vector<16x256xf32>
    %20 = arith.truncf %19 : vector<16x256xf32> to vector<16x256xbf16>
    %21 = tpu.concatenate %15, %20 in 1 : vector<16x256xbf16>, vector<16x256xbf16> -> vector<16x512xbf16>
    %22 = vector.extract_strided_slice %21 {offsets = [0, 0], sizes = [8, 512], strides = [1, 1]} : vector<16x512xbf16> to vector<8x512xbf16>
    %23 = vector.extract_strided_slice %21 {offsets = [8, 0], sizes = [8, 512], strides = [1, 1]} : vector<16x512xbf16> to vector<8x512xbf16>
    %24 = vector.extract_strided_slice %22 {offsets = [0, 0], sizes = [8, 32], strides = [1, 1]} : vector<8x512xbf16> to vector<8x32xbf16>
    %c0_10 = arith.constant 0 : index
    %c0_11 = arith.constant 0 : index
    %c0_12 = arith.constant 0 : index
    %25 = vector.load %arg6[%c0_10, %c0_11, %c0_12] : memref<1x8x1024xbf16, #tpu.memory_space<vmem>>, vector<1x8x32xbf16>
    %26 = vector.shape_cast %25 : vector<1x8x32xbf16> to vector<8x32xbf16>
    %27 = vector.shape_cast %24 : vector<8x32xbf16> to vector<1x8x32xbf16>
    tpu.vector_store %arg6[%c0_10, %c0_11, %c0_12], %27 {strides = array<i32>} : memref<1x8x1024xbf16, #tpu.memory_space<vmem>>, vector<1x8x32xbf16>,
    %28 = vector.extract_strided_slice %23 {offsets = [0, 0], sizes = [8, 32], strides = [1, 1]} : vector<8x512xbf16> to vector<8x32xbf16>
    %c0_13 = arith.constant 0 : index
    %c0_14 = arith.constant 0 : index
    %c32 = arith.constant 32 : index
    %29 = vector.load %arg6[%c0_13, %c0_14, %c32] : memref<1x8x1024xbf16, #tpu.memory_space<vmem>>, vector<1x8x32xbf16>
    %30 = vector.shape_cast %29 : vector<1x8x32xbf16> to vector<8x32xbf16>
    %31 = vector.shape_cast %28 : vector<8x32xbf16> to vector<1x8x32xbf16>
    tpu.vector_store %arg6[%c0_13, %c0_14, %c32], %31 {strides = array<i32>} : memref<1x8x1024xbf16, #tpu.memory_space<vmem>>, vector<1x8x32xbf16>,
    %32 = vector.extract_strided_slice %22 {offsets = [0, 32], sizes = [8, 32], strides = [1, 1]} : vector<8x512xbf16> to vector<8x32xbf16>
    %c0_15 = arith.constant 0 : index
    %c0_16 = arith.constant 0 : index
    %c64 = arith.constant 64 : index
    %33 = vector.load %arg6[%c0_15, %c0_16, %c64] : memref<1x8x1024xbf16, #tpu.memory_space<vmem>>, vector<1x8x32xbf16>
    %34 = vector.shape_cast %33 : vector<1x8x32xbf16> to vector<8x32xbf16>
    %35 = vector.shape_cast %32 : vector<8x32xbf16> to vector<1x8x32xbf16>
    tpu.vector_store %arg6[%c0_15, %c0_16, %c64], %35 {strides = array<i32>} : memref<1x8x1024xbf16, #tpu.memory_space<vmem>>, vector<1x8x32xbf16>,
    %36 = vector.extract_strided_slice %23 {offsets = [0, 32], sizes = [8, 32], strides = [1, 1]} : vector<8x512xbf16> to vector<8x32xbf16>
    %c0_17 = arith.constant 0 : index
    %c0_18 = arith.constant 0 : index
    %c96 = arith.constant 96 : index
    %37 = vector.load %arg6[%c0_17, %c0_18, %c96] : memref<1x8x1024xbf16, #tpu.memory_space<vmem>>, vector<1x8x32xbf16>
    %38 = vector.shape_cast %37 : vector<1x8x32xbf16> to vector<8x32xbf16>
    %39 = vector.shape_cast %36 : vector<8x32xbf16> to vector<1x8x32xbf16>
    tpu.vector_store %arg6[%c0_17, %c0_18, %c96], %39 {strides = array<i32>} : memref<1x8x1024xbf16, #tpu.memory_space<vmem>>, vector<1x8x32xbf16>,
    %40 = vector.extract_strided_slice %22 {offsets = [0, 64], sizes = [8, 32], strides = [1, 1]} : vector<8x512xbf16> to vector<8x32xbf16>
    %c0_19 = arith.constant 0 : index
    %c0_20 = arith.constant 0 : index
    %c128 = arith.constant 128 : index
    %41 = vector.load %arg6[%c0_19, %c0_20, %c128] : memref<1x8x1024xbf16, #tpu.memory_space<vmem>>, vector<1x8x32xbf16>
    %42 = vector.shape_cast %41 : vector<1x8x32xbf16> to vector<8x32xbf16>
    %43 = vector.shape_cast %40 : vector<8x32xbf16> to vector<1x8x32xbf16>
    tpu.vector_store %arg6[%c0_19, %c0_20, %c128], %43 {strides = array<i32>} : memref<1x8x1024xbf16, #tpu.memory_space<vmem>>, vector<1x8x32xbf16>,
    %44 = vector.extract_strided_slice %23 {offsets = [0, 64], sizes = [8, 32], strides = [1, 1]} : vector<8x512xbf16> to vector<8x32xbf16>
    %c0_21 = arith.constant 0 : index
    %c0_22 = arith.constant 0 : index
    %c160 = arith.constant 160 : index
    %45 = vector.load %arg6[%c0_21, %c0_22, %c160] : memref<1x8x1024xbf16, #tpu.memory_space<vmem>>, vector<1x8x32xbf16>
    %46 = vector.shape_cast %45 : vector<1x8x32xbf16> to vector<8x32xbf16>
    %47 = vector.shape_cast %44 : vector<8x32xbf16> to vector<1x8x32xbf16>
    tpu.vector_store %arg6[%c0_21, %c0_22, %c160], %47 {strides = array<i32>} : memref<1x8x1024xbf16, #tpu.memory_space<vmem>>, vector<1x8x32xbf16>,
    %48 = vector.extract_strided_slice %22 {offsets = [0, 96], sizes = [8, 32], strides = [1, 1]} : vector<8x512xbf16> to vector<8x32xbf16>
    %c0_23 = arith.constant 0 : index
    %c0_24 = arith.constant 0 : index
    %c192 = arith.constant 192 : index
    %49 = vector.load %arg6[%c0_23, %c0_24, %c192] : memref<1x8x1024xbf16, #tpu.memory_space<vmem>>, vector<1x8x32xbf16>
    %50 = vector.shape_cast %49 : vector<1x8x32xbf16> to vector<8x32xbf16>
    %51 = vector.shape_cast %48 : vector<8x32xbf16> to vector<1x8x32xbf16>
    tpu.vector_store %arg6[%c0_23, %c0_24, %c192], %51 {strides = array<i32>} : memref<1x8x1024xbf16, #tpu.memory_space<vmem>>, vector<1x8x32xbf16>,
    %52 = vector.extract_strided_slice %23 {offsets = [0, 96], sizes = [8, 32], strides = [1, 1]} : vector<8x512xbf16> to vector<8x32xbf16>
    %c0_25 = arith.constant 0 : index
    %c0_26 = arith.constant 0 : index
    %c224 = arith.constant 224 : index
    %53 = vector.load %arg6[%c0_25, %c0_26, %c224] : memref<1x8x1024xbf16, #tpu.memory_space<vmem>>, vector<1x8x32xbf16>
    %54 = vector.shape_cast %53 : vector<1x8x32xbf16> to vector<8x32xbf16>
    %55 = vector.shape_cast %52 : vector<8x32xbf16> to vector<1x8x32xbf16>
    tpu.vector_store %arg6[%c0_25, %c0_26, %c224], %55 {strides = array<i32>} : memref<1x8x1024xbf16, #tpu.memory_space<vmem>>, vector<1x8x32xbf16>,
    %56 = vector.extract_strided_slice %22 {offsets = [0, 128], sizes = [8, 32], strides = [1, 1]} : vector<8x512xbf16> to vector<8x32xbf16>
    %c0_27 = arith.constant 0 : index
    %c0_28 = arith.constant 0 : index
    %c256 = arith.constant 256 : index
    %57 = vector.load %arg6[%c0_27, %c0_28, %c256] : memref<1x8x1024xbf16, #tpu.memory_space<vmem>>, vector<1x8x32xbf16>
    %58 = vector.shape_cast %57 : vector<1x8x32xbf16> to vector<8x32xbf16>
    %59 = vector.shape_cast %56 : vector<8x32xbf16> to vector<1x8x32xbf16>
    tpu.vector_store %arg6[%c0_27, %c0_28, %c256], %59 {strides = array<i32>} : memref<1x8x1024xbf16, #tpu.memory_space<vmem>>, vector<1x8x32xbf16>,
    %60 = vector.extract_strided_slice %23 {offsets = [0, 128], sizes = [8, 32], strides = [1, 1]} : vector<8x512xbf16> to vector<8x32xbf16>
    %c0_29 = arith.constant 0 : index
    %c0_30 = arith.constant 0 : index
    %c288 = arith.constant 288 : index
    %61 = vector.load %arg6[%c0_29, %c0_30, %c288] : memref<1x8x1024xbf16, #tpu.memory_space<vmem>>, vector<1x8x32xbf16>
    %62 = vector.shape_cast %61 : vector<1x8x32xbf16> to vector<8x32xbf16>
    %63 = vector.shape_cast %60 : vector<8x32xbf16> to vector<1x8x32xbf16>
    tpu.vector_store %arg6[%c0_29, %c0_30, %c288], %63 {strides = array<i32>} : memref<1x8x1024xbf16, #tpu.memory_space<vmem>>, vector<1x8x32xbf16>,
    %64 = vector.extract_strided_slice %22 {offsets = [0, 160], sizes = [8, 32], strides = [1, 1]} : vector<8x512xbf16> to vector<8x32xbf16>
    %c0_31 = arith.constant 0 : index
    %c0_32 = arith.constant 0 : index
    %c320 = arith.constant 320 : index
    %65 = vector.load %arg6[%c0_31, %c0_32, %c320] : memref<1x8x1024xbf16, #tpu.memory_space<vmem>>, vector<1x8x32xbf16>
    %66 = vector.shape_cast %65 : vector<1x8x32xbf16> to vector<8x32xbf16>
    %67 = vector.shape_cast %64 : vector<8x32xbf16> to vector<1x8x32xbf16>
    tpu.vector_store %arg6[%c0_31, %c0_32, %c320], %67 {strides = array<i32>} : memref<1x8x1024xbf16, #tpu.memory_space<vmem>>, vector<1x8x32xbf16>,
    %68 = vector.extract_strided_slice %23 {offsets = [0, 160], sizes = [8, 32], strides = [1, 1]} : vector<8x512xbf16> to vector<8x32xbf16>
    %c0_33 = arith.constant 0 : index
    %c0_34 = arith.constant 0 : index
    %c352 = arith.constant 352 : index
    %69 = vector.load %arg6[%c0_33, %c0_34, %c352] : memref<1x8x1024xbf16, #tpu.memory_space<vmem>>, vector<1x8x32xbf16>
    %70 = vector.shape_cast %69 : vector<1x8x32xbf16> to vector<8x32xbf16>
    %71 = vector.shape_cast %68 : vector<8x32xbf16> to vector<1x8x32xbf16>
    tpu.vector_store %arg6[%c0_33, %c0_34, %c352], %71 {strides = array<i32>} : memref<1x8x1024xbf16, #tpu.memory_space<vmem>>, vector<1x8x32xbf16>,
    %72 = vector.extract_strided_slice %22 {offsets = [0, 192], sizes = [8, 32], strides = [1, 1]} : vector<8x512xbf16> to vector<8x32xbf16>
    %c0_35 = arith.constant 0 : index
    %c0_36 = arith.constant 0 : index
    %c384 = arith.constant 384 : index
    %73 = vector.load %arg6[%c0_35, %c0_36, %c384] : memref<1x8x1024xbf16, #tpu.memory_space<vmem>>, vector<1x8x32xbf16>
    %74 = vector.shape_cast %73 : vector<1x8x32xbf16> to vector<8x32xbf16>
    %75 = vector.shape_cast %72 : vector<8x32xbf16> to vector<1x8x32xbf16>
    tpu.vector_store %arg6[%c0_35, %c0_36, %c384], %75 {strides = array<i32>} : memref<1x8x1024xbf16, #tpu.memory_space<vmem>>, vector<1x8x32xbf16>,
    %76 = vector.extract_strided_slice %23 {offsets = [0, 192], sizes = [8, 32], strides = [1, 1]} : vector<8x512xbf16> to vector<8x32xbf16>
    %c0_37 = arith.constant 0 : index
    %c0_38 = arith.constant 0 : index
    %c416 = arith.constant 416 : index
    %77 = vector.load %arg6[%c0_37, %c0_38, %c416] : memref<1x8x1024xbf16, #tpu.memory_space<vmem>>, vector<1x8x32xbf16>
    %78 = vector.shape_cast %77 : vector<1x8x32xbf16> to vector<8x32xbf16>
    %79 = vector.shape_cast %76 : vector<8x32xbf16> to vector<1x8x32xbf16>
    tpu.vector_store %arg6[%c0_37, %c0_38, %c416], %79 {strides = array<i32>} : memref<1x8x1024xbf16, #tpu.memory_space<vmem>>, vector<1x8x32xbf16>,
    %80 = vector.extract_strided_slice %22 {offsets = [0, 224], sizes = [8, 32], strides = [1, 1]} : vector<8x512xbf16> to vector<8x32xbf16>
    %c0_39 = arith.constant 0 : index
    %c0_40 = arith.constant 0 : index
    %c448 = arith.constant 448 : index
    %81 = vector.load %arg6[%c0_39, %c0_40, %c448] : memref<1x8x1024xbf16, #tpu.memory_space<vmem>>, vector<1x8x32xbf16>
    %82 = vector.shape_cast %81 : vector<1x8x32xbf16> to vector<8x32xbf16>
    %83 = vector.shape_cast %80 : vector<8x32xbf16> to vector<1x8x32xbf16>
    tpu.vector_store %arg6[%c0_39, %c0_40, %c448], %83 {strides = array<i32>} : memref<1x8x1024xbf16, #tpu.memory_space<vmem>>, vector<1x8x32xbf16>,
    %84 = vector.extract_strided_slice %23 {offsets = [0, 224], sizes = [8, 32], strides = [1, 1]} : vector<8x512xbf16> to vector<8x32xbf16>
    %c0_41 = arith.constant 0 : index
    %c0_42 = arith.constant 0 : index
    %c480 = arith.constant 480 : index
    %85 = vector.load %arg6[%c0_41, %c0_42, %c480] : memref<1x8x1024xbf16, #tpu.memory_space<vmem>>, vector<1x8x32xbf16>
    %86 = vector.shape_cast %85 : vector<1x8x32xbf16> to vector<8x32xbf16>
    %87 = vector.shape_cast %84 : vector<8x32xbf16> to vector<1x8x32xbf16>
    tpu.vector_store %arg6[%c0_41, %c0_42, %c480], %87 {strides = array<i32>} : memref<1x8x1024xbf16, #tpu.memory_space<vmem>>, vector<1x8x32xbf16>,
    %88 = vector.extract_strided_slice %22 {offsets = [0, 256], sizes = [8, 32], strides = [1, 1]} : vector<8x512xbf16> to vector<8x32xbf16>
    %c0_43 = arith.constant 0 : index
    %c0_44 = arith.constant 0 : index
    %c512 = arith.constant 512 : index
    %89 = vector.load %arg6[%c0_43, %c0_44, %c512] : memref<1x8x1024xbf16, #tpu.memory_space<vmem>>, vector<1x8x32xbf16>
    %90 = vector.shape_cast %89 : vector<1x8x32xbf16> to vector<8x32xbf16>
    %91 = vector.shape_cast %88 : vector<8x32xbf16> to vector<1x8x32xbf16>
    tpu.vector_store %arg6[%c0_43, %c0_44, %c512], %91 {strides = array<i32>} : memref<1x8x1024xbf16, #tpu.memory_space<vmem>>, vector<1x8x32xbf16>,
    %92 = vector.extract_strided_slice %23 {offsets = [0, 256], sizes = [8, 32], strides = [1, 1]} : vector<8x512xbf16> to vector<8x32xbf16>
    %c0_45 = arith.constant 0 : index
    %c0_46 = arith.constant 0 : index
    %c544 = arith.constant 544 : index
    %93 = vector.load %arg6[%c0_45, %c0_46, %c544] : memref<1x8x1024xbf16, #tpu.memory_space<vmem>>, vector<1x8x32xbf16>
    %94 = vector.shape_cast %93 : vector<1x8x32xbf16> to vector<8x32xbf16>
    %95 = vector.shape_cast %92 : vector<8x32xbf16> to vector<1x8x32xbf16>
    tpu.vector_store %arg6[%c0_45, %c0_46, %c544], %95 {strides = array<i32>} : memref<1x8x1024xbf16, #tpu.memory_space<vmem>>, vector<1x8x32xbf16>,
    %96 = vector.extract_strided_slice %22 {offsets = [0, 288], sizes = [8, 32], strides = [1, 1]} : vector<8x512xbf16> to vector<8x32xbf16>
    %c0_47 = arith.constant 0 : index
    %c0_48 = arith.constant 0 : index
    %c576 = arith.constant 576 : index
    %97 = vector.load %arg6[%c0_47, %c0_48, %c576] : memref<1x8x1024xbf16, #tpu.memory_space<vmem>>, vector<1x8x32xbf16>
    %98 = vector.shape_cast %97 : vector<1x8x32xbf16> to vector<8x32xbf16>
    %99 = vector.shape_cast %96 : vector<8x32xbf16> to vector<1x8x32xbf16>
    tpu.vector_store %arg6[%c0_47, %c0_48, %c576], %99 {strides = array<i32>} : memref<1x8x1024xbf16, #tpu.memory_space<vmem>>, vector<1x8x32xbf16>,
    %100 = vector.extract_strided_slice %23 {offsets = [0, 288], sizes = [8, 32], strides = [1, 1]} : vector<8x512xbf16> to vector<8x32xbf16>
    %c0_49 = arith.constant 0 : index
    %c0_50 = arith.constant 0 : index
    %c608 = arith.constant 608 : index
    %101 = vector.load %arg6[%c0_49, %c0_50, %c608] : memref<1x8x1024xbf16, #tpu.memory_space<vmem>>, vector<1x8x32xbf16>
    %102 = vector.shape_cast %101 : vector<1x8x32xbf16> to vector<8x32xbf16>
    %103 = vector.shape_cast %100 : vector<8x32xbf16> to vector<1x8x32xbf16>
    tpu.vector_store %arg6[%c0_49, %c0_50, %c608], %103 {strides = array<i32>} : memref<1x8x1024xbf16, #tpu.memory_space<vmem>>, vector<1x8x32xbf16>,
    %104 = vector.extract_strided_slice %22 {offsets = [0, 320], sizes = [8, 32], strides = [1, 1]} : vector<8x512xbf16> to vector<8x32xbf16>
    %c0_51 = arith.constant 0 : index
    %c0_52 = arith.constant 0 : index
    %c640 = arith.constant 640 : index
    %105 = vector.load %arg6[%c0_51, %c0_52, %c640] : memref<1x8x1024xbf16, #tpu.memory_space<vmem>>, vector<1x8x32xbf16>
    %106 = vector.shape_cast %105 : vector<1x8x32xbf16> to vector<8x32xbf16>
    %107 = vector.shape_cast %104 : vector<8x32xbf16> to vector<1x8x32xbf16>
    tpu.vector_store %arg6[%c0_51, %c0_52, %c640], %107 {strides = array<i32>} : memref<1x8x1024xbf16, #tpu.memory_space<vmem>>, vector<1x8x32xbf16>,
    %108 = vector.extract_strided_slice %23 {offsets = [0, 320], sizes = [8, 32], strides = [1, 1]} : vector<8x512xbf16> to vector<8x32xbf16>
    %c0_53 = arith.constant 0 : index
    %c0_54 = arith.constant 0 : index
    %c672 = arith.constant 672 : index
    %109 = vector.load %arg6[%c0_53, %c0_54, %c672] : memref<1x8x1024xbf16, #tpu.memory_space<vmem>>, vector<1x8x32xbf16>
    %110 = vector.shape_cast %109 : vector<1x8x32xbf16> to vector<8x32xbf16>
    %111 = vector.shape_cast %108 : vector<8x32xbf16> to vector<1x8x32xbf16>
    tpu.vector_store %arg6[%c0_53, %c0_54, %c672], %111 {strides = array<i32>} : memref<1x8x1024xbf16, #tpu.memory_space<vmem>>, vector<1x8x32xbf16>,
    %112 = vector.extract_strided_slice %22 {offsets = [0, 352], sizes = [8, 32], strides = [1, 1]} : vector<8x512xbf16> to vector<8x32xbf16>
    %c0_55 = arith.constant 0 : index
    %c0_56 = arith.constant 0 : index
    %c704 = arith.constant 704 : index
    %113 = vector.load %arg6[%c0_55, %c0_56, %c704] : memref<1x8x1024xbf16, #tpu.memory_space<vmem>>, vector<1x8x32xbf16>
    %114 = vector.shape_cast %113 : vector<1x8x32xbf16> to vector<8x32xbf16>
    %115 = vector.shape_cast %112 : vector<8x32xbf16> to vector<1x8x32xbf16>
    tpu.vector_store %arg6[%c0_55, %c0_56, %c704], %115 {strides = array<i32>} : memref<1x8x1024xbf16, #tpu.memory_space<vmem>>, vector<1x8x32xbf16>,
    %116 = vector.extract_strided_slice %23 {offsets = [0, 352], sizes = [8, 32], strides = [1, 1]} : vector<8x512xbf16> to vector<8x32xbf16>
    %c0_57 = arith.constant 0 : index
    %c0_58 = arith.constant 0 : index
    %c736 = arith.constant 736 : index
    %117 = vector.load %arg6[%c0_57, %c0_58, %c736] : memref<1x8x1024xbf16, #tpu.memory_space<vmem>>, vector<1x8x32xbf16>
    %118 = vector.shape_cast %117 : vector<1x8x32xbf16> to vector<8x32xbf16>
    %119 = vector.shape_cast %116 : vector<8x32xbf16> to vector<1x8x32xbf16>
    tpu.vector_store %arg6[%c0_57, %c0_58, %c736], %119 {strides = array<i32>} : memref<1x8x1024xbf16, #tpu.memory_space<vmem>>, vector<1x8x32xbf16>,
    %120 = vector.extract_strided_slice %22 {offsets = [0, 384], sizes = [8, 32], strides = [1, 1]} : vector<8x512xbf16> to vector<8x32xbf16>
    %c0_59 = arith.constant 0 : index
    %c0_60 = arith.constant 0 : index
    %c768 = arith.constant 768 : index
    %121 = vector.load %arg6[%c0_59, %c0_60, %c768] : memref<1x8x1024xbf16, #tpu.memory_space<vmem>>, vector<1x8x32xbf16>
    %122 = vector.shape_cast %121 : vector<1x8x32xbf16> to vector<8x32xbf16>
    %123 = vector.shape_cast %120 : vector<8x32xbf16> to vector<1x8x32xbf16>
    tpu.vector_store %arg6[%c0_59, %c0_60, %c768], %123 {strides = array<i32>} : memref<1x8x1024xbf16, #tpu.memory_space<vmem>>, vector<1x8x32xbf16>,
    %124 = vector.extract_strided_slice %23 {offsets = [0, 384], sizes = [8, 32], strides = [1, 1]} : vector<8x512xbf16> to vector<8x32xbf16>
    %c0_61 = arith.constant 0 : index
    %c0_62 = arith.constant 0 : index
    %c800 = arith.constant 800 : index
    %125 = vector.load %arg6[%c0_61, %c0_62, %c800] : memref<1x8x1024xbf16, #tpu.memory_space<vmem>>, vector<1x8x32xbf16>
    %126 = vector.shape_cast %125 : vector<1x8x32xbf16> to vector<8x32xbf16>
    %127 = vector.shape_cast %124 : vector<8x32xbf16> to vector<1x8x32xbf16>
    tpu.vector_store %arg6[%c0_61, %c0_62, %c800], %127 {strides = array<i32>} : memref<1x8x1024xbf16, #tpu.memory_space<vmem>>, vector<1x8x32xbf16>,
    %128 = vector.extract_strided_slice %22 {offsets = [0, 416], sizes = [8, 32], strides = [1, 1]} : vector<8x512xbf16> to vector<8x32xbf16>
    %c0_63 = arith.constant 0 : index
    %c0_64 = arith.constant 0 : index
    %c832 = arith.constant 832 : index
    %129 = vector.load %arg6[%c0_63, %c0_64, %c832] : memref<1x8x1024xbf16, #tpu.memory_space<vmem>>, vector<1x8x32xbf16>
    %130 = vector.shape_cast %129 : vector<1x8x32xbf16> to vector<8x32xbf16>
    %131 = vector.shape_cast %128 : vector<8x32xbf16> to vector<1x8x32xbf16>
    tpu.vector_store %arg6[%c0_63, %c0_64, %c832], %131 {strides = array<i32>} : memref<1x8x1024xbf16, #tpu.memory_space<vmem>>, vector<1x8x32xbf16>,
    %132 = vector.extract_strided_slice %23 {offsets = [0, 416], sizes = [8, 32], strides = [1, 1]} : vector<8x512xbf16> to vector<8x32xbf16>
    %c0_65 = arith.constant 0 : index
    %c0_66 = arith.constant 0 : index
    %c864 = arith.constant 864 : index
    %133 = vector.load %arg6[%c0_65, %c0_66, %c864] : memref<1x8x1024xbf16, #tpu.memory_space<vmem>>, vector<1x8x32xbf16>
    %134 = vector.shape_cast %133 : vector<1x8x32xbf16> to vector<8x32xbf16>
    %135 = vector.shape_cast %132 : vector<8x32xbf16> to vector<1x8x32xbf16>
    tpu.vector_store %arg6[%c0_65, %c0_66, %c864], %135 {strides = array<i32>} : memref<1x8x1024xbf16, #tpu.memory_space<vmem>>, vector<1x8x32xbf16>,
    %136 = vector.extract_strided_slice %22 {offsets = [0, 448], sizes = [8, 32], strides = [1, 1]} : vector<8x512xbf16> to vector<8x32xbf16>
    %c0_67 = arith.constant 0 : index
    %c0_68 = arith.constant 0 : index
    %c896 = arith.constant 896 : index
    %137 = vector.load %arg6[%c0_67, %c0_68, %c896] : memref<1x8x1024xbf16, #tpu.memory_space<vmem>>, vector<1x8x32xbf16>
    %138 = vector.shape_cast %137 : vector<1x8x32xbf16> to vector<8x32xbf16>
    %139 = vector.shape_cast %136 : vector<8x32xbf16> to vector<1x8x32xbf16>
    tpu.vector_store %arg6[%c0_67, %c0_68, %c896], %139 {strides = array<i32>} : memref<1x8x1024xbf16, #tpu.memory_space<vmem>>, vector<1x8x32xbf16>,
    %140 = vector.extract_strided_slice %23 {offsets = [0, 448], sizes = [8, 32], strides = [1, 1]} : vector<8x512xbf16> to vector<8x32xbf16>
    %c0_69 = arith.constant 0 : index
    %c0_70 = arith.constant 0 : index
    %c928 = arith.constant 928 : index
    %141 = vector.load %arg6[%c0_69, %c0_70, %c928] : memref<1x8x1024xbf16, #tpu.memory_space<vmem>>, vector<1x8x32xbf16>
    %142 = vector.shape_cast %141 : vector<1x8x32xbf16> to vector<8x32xbf16>
    %143 = vector.shape_cast %140 : vector<8x32xbf16> to vector<1x8x32xbf16>
    tpu.vector_store %arg6[%c0_69, %c0_70, %c928], %143 {strides = array<i32>} : memref<1x8x1024xbf16, #tpu.memory_space<vmem>>, vector<1x8x32xbf16>,
    %144 = vector.extract_strided_slice %22 {offsets = [0, 480], sizes = [8, 32], strides = [1, 1]} : vector<8x512xbf16> to vector<8x32xbf16>
    %c0_71 = arith.constant 0 : index
    %c0_72 = arith.constant 0 : index
    %c960 = arith.constant 960 : index
    %145 = vector.load %arg6[%c0_71, %c0_72, %c960] : memref<1x8x1024xbf16, #tpu.memory_space<vmem>>, vector<1x8x32xbf16>
    %146 = vector.shape_cast %145 : vector<1x8x32xbf16> to vector<8x32xbf16>
    %147 = vector.shape_cast %144 : vector<8x32xbf16> to vector<1x8x32xbf16>
    tpu.vector_store %arg6[%c0_71, %c0_72, %c960], %147 {strides = array<i32>} : memref<1x8x1024xbf16, #tpu.memory_space<vmem>>, vector<1x8x32xbf16>,
    %148 = vector.extract_strided_slice %23 {offsets = [0, 480], sizes = [8, 32], strides = [1, 1]} : vector<8x512xbf16> to vector<8x32xbf16>
    %c0_73 = arith.constant 0 : index
    %c0_74 = arith.constant 0 : index
    %c992 = arith.constant 992 : index
    %149 = vector.load %arg6[%c0_73, %c0_74, %c992] : memref<1x8x1024xbf16, #tpu.memory_space<vmem>>, vector<1x8x32xbf16>
    %150 = vector.shape_cast %149 : vector<1x8x32xbf16> to vector<8x32xbf16>
    %151 = vector.shape_cast %148 : vector<8x32xbf16> to vector<1x8x32xbf16>
    tpu.vector_store %arg6[%c0_73, %c0_74, %c992], %151 {strides = array<i32>} : memref<1x8x1024xbf16, #tpu.memory_space<vmem>>, vector<1x8x32xbf16>,
    return
  }
  func.func @transform_0(%arg0: i32, %arg1: i32) -> (i32, i32, i32) {
    %c0_i32 = arith.constant 0 : i32
    %c0_i32_0 = arith.constant 0 : i32
    return %arg0, %c0_i32, %arg1 : i32, i32, i32
  }
  func.func @transform_1(%arg0: i32, %arg1: i32) -> (i32, i32) {
    %c0_i32 = arith.constant 0 : i32
    %c0_i32_0 = arith.constant 0 : i32
    %c0_i32_1 = arith.constant 0 : i32
    return %c0_i32, %c0_i32_0 : i32, i32
  }
  func.func @transform_2(%arg0: i32, %arg1: i32) -> (i32, i32) {
    %c0_i32 = arith.constant 0 : i32
    %c0_i32_0 = arith.constant 0 : i32
    %c0_i32_1 = arith.constant 0 : i32
    return %c0_i32, %c0_i32_0 : i32, i32
  }
  func.func @transform_3(%arg0: i32, %arg1: i32) -> (i32, i32) {
    %c0_i32 = arith.constant 0 : i32
    %c0_i32_0 = arith.constant 0 : i32
    %c0_i32_1 = arith.constant 0 : i32
    return %c0_i32, %c0_i32_0 : i32, i32
  }
  func.func @transform_4(%arg0: i32, %arg1: i32) -> (i32, i32, i32) {
    %c0_i32 = arith.constant 0 : i32
    %c0_i32_0 = arith.constant 0 : i32
    return %arg0, %c0_i32, %arg1 : i32, i32, i32
  }
}

</mosaic_0001>

<bundles_post_ra>
// kernel: _upsample_core.1
= control target key start
LH: loop header
LB: loop body
LE: loop exit
PB: predicated region body
PF: predicated region fallthrough
CT: control target
= control target key end

     0   :  { %s1058_s15 = smov 0   ;;  %s1060_s16 = smov 0   ;;  %s1293_s0 = inlined_call_operand.vmem [shape: bf16[2,4,256], index: 0, kind: input, shape index: {}]   ;;  %s1294_s1 = inlined_call_operand.vmem [shape: bf16[32,4], index: 1, kind: input, shape index: {}]   ;;  %s1295_s2 = inlined_call_operand.vmem [shape: bf16[256,256], index: 2, kind: input, shape index: {}]   ;;  %s1296_s3 = inlined_call_operand.vmem [shape: f32[32,1], index: 3, kind: input, shape index: {}]   ;;  %s1297_s4 = inlined_call_operand.vmem [shape: bf16[2,8,1024], index: 4, kind: output, shape index: {}]  }
   0x1   :  { %s1062_s17 = smov 0  }
   0x2 LB: > { %s26_s18 = sadd.s32 1, %s1023_s16  ;;  %p862_p0 = scmp.ge.s32.totalorder %s1027_s17, 1  ;;  %s1027_s17 = sphi %s1062_s17, %s14_s17   ;;  %s1023_s16 = sphi %s1060_s16, %s1299_s16   ;;  %s1019_s15 = sphi %s1058_s15, %s1298_s15  }
   0x3   : > { %p28_p1 = scmp.ge.s32.totalorder %s26_s18, 2  ;;  %p183_p2 = scmp.lt.s32.totalorder %s1027_s17, 3 }
   0x5   : > { %s1301_s18 = smov (%p28_p1, %s26_s18), 0  ;;  %p184_p3 = pnand %p862_p0, %p183_p2 }
   0x6   : > { %p218_p4 = scmp.lt.s32.totalorder (!%p184_p3), %s1019_s15, 1  ;;  %v1029_v0 = vmov (!%p184_p3), 0   ;;  %v243_v1 = vld [vmem:[%s1296_s3] sm:$0xff] (!%p184_p3)  ;;  %v245_v2 = vld [vmem:[%s1296_s3 + $0x10] sm:$0xff] (!%p184_p3)  ;;  %v244_v3 = vld [vmem:[%s1296_s3 + $0x8] sm:$0xff] (!%p184_p3)  ;;  %vm293_vm0 = vcmask (!%p184_p3), 1041408  }
   0x7   : > { %187 = sbr.rel (%p184_p3) target bundleno = 625 (0x271), region = 36  ;;  %332 = vmatprep.mubr.bf16.mxu0 (!%p184_p3), %v1029_v0  ;;  %954 = vset.pattern.permute.xlu1 (!%p184_p3), %v1029_v0  ;;  %v246_v4 = vld [vmem:[%s1296_s3 + $0x18] sm:$0xff] (!%p184_p3)  ;;  %v957_v5 = vld [vmem:[%s1295_s2 + $0x4] ss:$8 sps:$4 sm:$0xff] (!%p184_p3)   ;;  %v959_v6 = vld [vmem:[%s1295_s2] ss:$8 sps:$4 sm:$0xff] (!%p184_p3)  }
   0x8   : > { %953 = vset.pattern.permute.xlu0 (!%p184_p3), %v1029_v0  ;;  %249 = vperm.xlu1 (!%p184_p3), %954, %v243_v1   ;;  %v960_v7 = vld [vmem:[%s1295_s2 + $0x14] ss:$8 sps:$4 sm:$0xff] (!%p184_p3)   ;;  %v962_v11 = vld [vmem:[%s1295_s2 + $0x10] ss:$8 sps:$4 sm:$0xff] (!%p184_p3)   ;;  %v955_v12 = vld [vmem:[%s1294_s1] sm:$0xff] (!%p184_p3)   ;;  %vm286_vm1 = vcmask (!%p184_p3), 31744  }
   0x9   : > { %259 = vperm.xlu0 (!%p184_p3), %953, %v245_v2   ;;  %549 = vmatprep.subr.bf16.mxu1 (!%p184_p3), %v957_v5  ;;  %v963_v13 = vld [vmem:[%s1295_s2 + $0x24] ss:$8 sps:$4 sm:$0xff] (!%p184_p3)   ;;  %v965_v14 = vld [vmem:[%s1295_s2 + $0x20] ss:$8 sps:$4 sm:$0xff] (!%p184_p3)   ;;  %v966_v15 = vld [vmem:[%s1295_s2 + $0x34] ss:$8 sps:$4 sm:$0xff] (!%p184_p3)  }
   0xa   : > { %550 = vmatpush1.bf16.msra.mxu1 (!%p184_p3), %v959_v6  ;;  %v968_v16 = vld [vmem:[%s1295_s2 + $0x30] ss:$8 sps:$4 sm:$0xff] (!%p184_p3)   ;;  %v956_v17 = vld [vmem:[%s1294_s1 + $0x8] sm:$0xff] (!%p184_p3)   ;;  %v972_v20 = vld [vmem:[%s1295_s2 + $0x54] ss:$8 sps:$4 sm:$0xff] (!%p184_p3)   ;;  %vm639_vm2 = vcmask (!%p184_p3), 257024  }
   0xb   : > { %551 = vmatprep.subr.bf16.mxu1 (!%p184_p3), %v960_v7  ;;  %v969_v18 = vld [vmem:[%s1295_s2 + $0x44] ss:$8 sps:$4 sm:$0xff] (!%p184_p3)   ;;  %v971_v19 = vld [vmem:[%s1295_s2 + $0x40] ss:$8 sps:$4 sm:$0xff] (!%p184_p3)   ;;  %v974_v21 = vld [vmem:[%s1295_s2 + $0x50] ss:$8 sps:$4 sm:$0xff] (!%p184_p3)  }
   0xc   : > { %254 = vperm.xlu1 (!%p184_p3), %954, %v244_v3   ;;  %v975_v22 = vld [vmem:[%s1295_s2 + $0x64] ss:$8 sps:$4 sm:$0xff] (!%p184_p3)   ;;  %v977_v23 = vld [vmem:[%s1295_s2 + $0x60] ss:$8 sps:$4 sm:$0xff] (!%p184_p3)   ;;  %v978_v24 = vld [vmem:[%s1295_s2 + $0x74] ss:$8 sps:$4 sm:$0xff] (!%p184_p3)  }
   0xd   : > { %264 = vperm.xlu0 (!%p184_p3), %953, %v246_v4   ;;  %v980_v25 = vld [vmem:[%s1295_s2 + $0x70] ss:$8 sps:$4 sm:$0xff] (!%p184_p3)   ;;  %v981_v26 = vld [vmem:[%s1295_s2 + $0x84] ss:$8 sps:$4 sm:$0xff] (!%p184_p3)   ;;  %v983_v27 = vld [vmem:[%s1295_s2 + $0x80] ss:$8 sps:$4 sm:$0xff] (!%p184_p3)  }
   0xe   : > { %s1303_s15 = smov (!%p218_p4, %s1019_s15), 1  ;;  %552 = vmatpush1.bf16.msra.mxu1 %v962_v11  ;;  %v984_v28 = vld [vmem:[%s1295_s2 + $0x94] ss:$8 sps:$4 sm:$0xff]   ;;  %v986_v29 = vld [vmem:[%s1295_s2 + $0x90] ss:$8 sps:$4 sm:$0xff]   ;;  %s1030_s11 = smov 96  }
   0xf   : > { %s915_s27 = sshll.u32 %s1303_s15, 2  ;;  %553 = vmatprep.subr.bf16.mxu1 %v963_v13  ;;  %v987_v30 = vld [vmem:[%s1295_s2 + $0xa4] ss:$8 sps:$4 sm:$0xff]   ;;  %v989_v31 = vld [vmem:[%s1295_s2 + $0xa0] ss:$8 sps:$4 sm:$0xff]   ;;  %s916_s7 = sshll.u32 %s1303_s15, 5 }
  0x10   : > { %s225_s6 = scalar_lea.vmem %s1293_s0, %s915_s27  ;;  %v990_v32 = vld [vmem:[%s1295_s2 + $0xb4] ss:$8 sps:$4 sm:$0xff]   ;;  %v992_v33 = vld [vmem:[%s1295_s2 + $0xb0] ss:$8 sps:$4 sm:$0xff]   ;;  %v993_v34 = vld [vmem:[%s1295_s2 + $0xc4] ss:$8 sps:$4 sm:$0xff]   ;;  %s1202_s10 = scalar_lea.vmem %s1297_s4, %s916_s7 }
  0x11   : > { %v869_v8 = vld.sshfl [vmem:[%s225_s6] sm:$0x33 pattern:$0x76325410]  ;;  %v996_v36 = vld [vmem:[%s1295_s2 + $0xd4] ss:$8 sps:$4 sm:$0xff]  }
  0x12   : > { %v285_v9 = vcombine.high %v869_v8, %v869_v8  ;;  %v295_v10 = vsel %vm293_vm0, %v869_v8, 0  ;;  %554 = vmatpush1.bf16.msra.mxu1 %v965_v14  ;;  %v995_v35 = vld [vmem:[%s1295_s2 + $0xc0] ss:$8 sps:$4 sm:$0xff]   ;;  %v998_v37 = vld [vmem:[%s1295_s2 + $0xd0] ss:$8 sps:$4 sm:$0xff]   ;;  %s1031_s15 = smov 64  }
  0x13   : > { %555 = vmatprep.subr.bf16.mxu1 %v966_v15  ;;  %v999_v38 = vld [vmem:[%s1295_s2 + $0xe4] ss:$8 sps:$4 sm:$0xff]   ;;  %v1001_v39 = vld [vmem:[%s1295_s2 + $0xe0] ss:$8 sps:$4 sm:$0xff]   ;;  %v1002_v40 = vld [vmem:[%s1295_s2 + $0xf4] ss:$8 sps:$4 sm:$0xff]  }
  0x14   : > { %870 = vmatprep.subr.msk.bf16.mxu0 %vm293_vm0, %v285_v9  ;;  %v1004_v41 = vld [vmem:[%s1295_s2 + $0xf0] ss:$8 sps:$4 sm:$0xff]   ;;  %s1032_s12 = smov 32   ;;  %vm647_vm3 = vcmask 519424   ;;  %vm654_vm4 = vcmask 781824   ;;  %vm659_vm5 = vcmask 1044224  }
  0x15   : > { %301 = vmatpush1.bf16.msra.mxu0 %v295_v10 }
  0x16   : > { %594 = vmatprep.subr.bf16.mxu0 %v957_v5  ;;  %556 = vmatpush1.bf16.msra.mxu1 %v968_v16 }
  0x17   : > { %557 = vmatprep.subr.bf16.mxu1 %v969_v18 }
  0x18   : > { %871 = vmatmul.mubr.msk.bf16.vlgmr.msra.gmra.mrb[0].mxu0 %vm286_vm1, %v955_v12 }
  0x19   : > { %342 = vmatprep.mubr.bf16.mxu0 %v1029_v0  ;;  %595 = vmatpush1.bf16.msra.mxu0 %v959_v6 }
  0x1a   : > { %596 = vmatprep.subr.bf16.mxu0 %v960_v7  ;;  %558 = vmatpush1.bf16.msra.mxu1 %v971_v19 }
  0x1b   : > { %559 = vmatprep.subr.bf16.mxu1 %v972_v20 }
  0x1d   : > { %597 = vmatpush1.bf16.msra.mxu0 %v962_v11 }
  0x1e   : > { %598 = vmatprep.subr.bf16.mxu0 %v963_v13  ;;  %560 = vmatpush1.bf16.msra.mxu1 %v974_v21 }
  0x1f   : > { %561 = vmatprep.subr.bf16.mxu1 %v975_v22 }
  0x20   : > { %872 = vmatmul.mubr.msk.bf16.gmra.mrb[4].mxu0 %vm286_vm1, %v956_v17 }
  0x21   : > { %599 = vmatpush1.bf16.msra.mxu0 %v965_v14 }
  0x22   : > { %600 = vmatprep.subr.bf16.mxu0 %v966_v15  ;;  %562 = vmatpush1.bf16.msra.mxu1 %v977_v23 }
  0x23   : > { %563 = vmatprep.subr.bf16.mxu1 %v978_v24 }
  0x25   : > { %601 = vmatpush1.bf16.msra.mxu0 %v968_v16 }
  0x26   : > { %602 = vmatprep.subr.bf16.mxu0 %v969_v18  ;;  %564 = vmatpush1.bf16.msra.mxu1 %v980_v25 }
  0x27   : > { %565 = vmatprep.subr.bf16.mxu1 %v981_v26 }
  0x29   : > { %603 = vmatpush1.bf16.msra.mxu0 %v971_v19 }
  0x2a   : > { %604 = vmatprep.subr.bf16.mxu0 %v972_v20  ;;  %566 = vmatpush1.bf16.msra.mxu1 %v983_v27 }
  0x2b   : > { %567 = vmatprep.subr.bf16.mxu1 %v984_v28 }
  0x2d   : > { %605 = vmatpush1.bf16.msra.mxu0 %v974_v21 }
  0x2e   : > { %606 = vmatprep.subr.bf16.mxu0 %v975_v22  ;;  %568 = vmatpush1.bf16.msra.mxu1 %v986_v29 }
  0x2f   : > { %569 = vmatprep.subr.bf16.mxu1 %v987_v30 }
  0x31   : > { %607 = vmatpush1.bf16.msra.mxu0 %v977_v23 }
  0x32   : > { %608 = vmatprep.subr.bf16.mxu0 %v978_v24  ;;  %570 = vmatpush1.bf16.msra.mxu1 %v989_v31 }
  0x33   : > { %571 = vmatprep.subr.bf16.mxu1 %v990_v32 }
  0x35   : > { %609 = vmatpush1.bf16.msra.mxu0 %v980_v25 }
  0x36   : > { %610 = vmatprep.subr.bf16.mxu0 %v981_v26  ;;  %572 = vmatpush1.bf16.msra.mxu1 %v992_v33 }
  0x37   : > { %573 = vmatprep.subr.bf16.mxu1 %v993_v34 }
  0x39   : > { %611 = vmatpush1.bf16.msra.mxu0 %v983_v27 }
  0x3a   : > { %612 = vmatprep.subr.bf16.mxu0 %v984_v28  ;;  %574 = vmatpush1.bf16.msra.mxu1 %v995_v35 }
  0x3b   : > { %575 = vmatprep.subr.bf16.mxu1 %v996_v36 }
  0x3d   : > { %613 = vmatpush1.bf16.msra.mxu0 %v986_v29 }
  0x3e   : > { %614 = vmatprep.subr.bf16.mxu0 %v987_v30  ;;  %576 = vmatpush1.bf16.msra.mxu1 %v998_v37 }
  0x3f   : > { %577 = vmatprep.subr.bf16.mxu1 %v999_v38 }
  0x41   : > { %615 = vmatpush1.bf16.msra.mxu0 %v989_v31 }
  0x42   : > { %616 = vmatprep.subr.bf16.mxu0 %v990_v32  ;;  %578 = vmatpush1.bf16.msra.mxu1 %v1001_v39 }
  0x43   : > { %579 = vmatprep.subr.bf16.mxu1 %v1002_v40 }
  0x45   : > { %617 = vmatpush1.bf16.msra.mxu0 %v992_v33 }
  0x46   : > { %618 = vmatprep.subr.bf16.mxu0 %v993_v34  ;;  %580 = vmatpush1.bf16.msra.mxu1 %v1004_v41 }
  0x49   : > { %619 = vmatpush1.bf16.msra.mxu0 %v995_v35 }
  0x4a   : > { %620 = vmatprep.subr.bf16.mxu0 %v996_v36 }
  0x4d   : > { %621 = vmatpush1.bf16.msra.mxu0 %v998_v37 }
  0x4e   : > { %622 = vmatprep.subr.bf16.mxu0 %v999_v38 }
  0x51   : > { %623 = vmatpush1.bf16.msra.mxu0 %v1001_v39 }
  0x52   : > { %624 = vmatprep.subr.bf16.mxu0 %v1002_v40 }
  0x55   : > { %625 = vmatpush1.bf16.msra.mxu0 %v1004_v41 }
  0x87   : > { %v250_v42 = vpop.permute.xlu1 %249 }
  0x88   : > { %v260_v51 = vpop.permute.xlu0 %259 }
  0x8b   : > { %v255_v44 = vpop.permute.xlu1 %254 }
  0x8c   : > { %v265_v57 = vpop.permute.xlu0 %264 }
  0xeb   : > { %v334_v43 = vpop.f32.mrb[0].mxu0 }
  0xec   : > { %v336_v45 = vpop.f32.mrb[1].mxu0  ;;  %v335_v47 = vadd.f32 %v334_v43, %v250_v42 }
  0xed   : > { %v338_v46 = vpop.f32.mrb[2].mxu0  ;;  %v337_v50 = vadd.f32 %v336_v45, %v250_v42 }
  0xee   : > { %v339_v48 = vadd.f32 %v338_v46, %v255_v44  ;;  %v340_v49 = vpop.f32.mrb[3].mxu0 }
  0xef   : > { %v341_v52 = vadd.f32 %v340_v49, %v255_v44 }
  0xf0   : > { %v353_v53 = vpack.c.bf16 %v339_v48, %v335_v47 }
  0xf1   : > { %v354_v54 = vpack.c.bf16 %v341_v52, %v337_v50 }
  0xf3   : > { %v344_v55 = vpop.f32.mrb[4].mxu0 }
  0xf4   : > { %v346_v56 = vpop.f32.mrb[5].mxu0  ;;  %v345_v59 = vadd.f32 %v344_v55, %v260_v51 }
  0xf5   : > { %v348_v58 = vpop.f32.mrb[6].mxu0  ;;  %v347_v62 = vadd.f32 %v346_v56, %v260_v51 }
  0xf6   : > { %v349_v60 = vadd.f32 %v348_v58, %v265_v57  ;;  %v350_v61 = vpop.f32.mrb[7].mxu0 }
  0xf7   : > { %v351_v63 = vadd.f32 %v350_v61, %v265_v57 }
  0xf8   : > { %v355_v0 = vpack.c.bf16 %v349_v60, %v345_v59 }
  0xf9   : > { %v356_v1 = vpack.c.bf16 %v351_v63, %v347_v62 }
  0xfa   : > { %581 = vmatprep.mubr.bf16.mxu1 %v355_v0 }
  0xfb   : > { %582 = vmatmul.mubr.bf16.vlgmr.msra.gmra.mrb[0].mxu1 %v353_v53  ;;  %626 = vmatprep.mubr.bf16.mxu0 %v356_v1 }
  0xfc   : > { %627 = vmatmul.mubr.bf16.vlgmr.msra.gmra.mrb[8].mxu0 %v354_v54 }
 0x1ce   : > { %v583_v2 = vpop.f32.mrb[0].mxu1 }
 0x1cf   : > { %v918_v3 = vpack.c.bf16 %v583_v2, %v583_v2  ;;  %v585_v4 = vpop.f32.mrb[1].mxu1  ;;  %v628_v5 = vpop.f32.mrb[8].mxu0 }
 0x1d0   : > { %v587_v6 = vpop.f32.mrb[2].mxu1  ;;  %v630_v7 = vpop.f32.mrb[9].mxu0  ;;  %v920_v14 = vpack.c.bf16 %v585_v4, %v585_v4  ;;  %v922_v16 = vpack.c.bf16 %v628_v5, %v628_v5 }
 0x1d1   : > { %v592_v8 = vpack.c.bf16 %v587_v6, %v583_v2  ;;  %v632_v9 = vpop.f32.mrb[10].mxu0  ;;  %669 = vrot.lane.b32.xlu1 %v918_v3, %s1030_s11  ;;  %661 = vrot.lane.b32.xlu0 %v918_v3, %s1031_s15  ;;  %v589_v10 = vpop.f32.mrb[3].mxu1  ;;  %v924_v17 = vpack.c.bf16 %v630_v7, %v630_v7  ;;  %v917_v18 = vpack.c.bf16 %v587_v6, %v587_v6 }
 0x1d2   : > { %v637_v11 = vpack.c.bf16 %v632_v9, %v628_v5  ;;  %v593_v12 = vpack.c.bf16 %v589_v10, %v585_v4  ;;  %v634_v13 = vpop.f32.mrb[11].mxu0  ;;  %v919_v19 = vpack.c.bf16 %v589_v10, %v589_v10  ;;  %v921_v20 = vpack.c.bf16 %v632_v9, %v632_v9 }
 0x1d3   : > { %640 = vst.msk [vmem:[%s1202_s10] sm:$0xf] %vm639_vm2, %v592_v8  ;;  %v638_v15 = vpack.c.bf16 %v634_v13, %v630_v7  ;;  %v923_v21 = vpack.c.bf16 %v634_v13, %v634_v13 }
 0x1d4   : > { %707 = vst.msk [vmem:[%s1202_s10 + $0x10] sm:$0xf] %vm639_vm2, %v637_v11  ;;  %675 = vst.msk [vmem:[%s1202_s10 + $0x8] sm:$0xf] %vm639_vm2, %v593_v12 }
 0x1d5   : > { %739 = vst.msk [vmem:[%s1202_s10 + $0x18] sm:$0xf] %vm639_vm2, %v638_v15  ;;  %651 = vrot.lane.b32.xlu0 %v918_v3, %s1032_s12  ;;  %693 = vrot.lane.b32.xlu1 %v920_v14, %s1031_s15 }
 0x1d9   : > { %725 = vrot.lane.b32.xlu0 %v922_v16, %s1031_s15  ;;  %701 = vrot.lane.b32.xlu1 %v920_v14, %s1030_s11 }
 0x1dd   : > { %685 = vrot.lane.b32.xlu0 %v920_v14, %s1032_s12  ;;  %733 = vrot.lane.b32.xlu1 %v922_v16, %s1030_s11 }
 0x1e1   : > { %717 = vrot.lane.b32.xlu0 %v922_v16, %s1032_s12  ;;  %757 = vrot.lane.b32.xlu1 %v924_v17, %s1031_s15 }
 0x1e5   : > { %665 = vrot.lane.b32.xlu1 %v917_v18, %s1030_s11  ;;  %644 = vrot.lane.b32.xlu0 %v917_v18, %s1032_s12 }
 0x1e9   : > { %765 = vrot.lane.b32.xlu1 %v924_v17, %s1030_s11  ;;  %749 = vrot.lane.b32.xlu0 %v924_v17, %s1032_s12 }
 0x1ed   : > { %656 = vrot.lane.b32.xlu0 %v917_v18, %s1031_s15  ;;  %697 = vrot.lane.b32.xlu1 %v919_v19, %s1030_s11 }
 0x1f1   : > { %729 = vrot.lane.b32.xlu1 %v921_v20, %s1030_s11  ;;  %679 = vrot.lane.b32.xlu0 %v919_v19, %s1032_s12 }
 0x1f5   : > { %689 = vrot.lane.b32.xlu1 %v919_v19, %s1031_s15  ;;  %711 = vrot.lane.b32.xlu0 %v921_v20, %s1032_s12 }
 0x1f9   : > { %761 = vrot.lane.b32.xlu1 %v923_v21, %s1030_s11  ;;  %743 = vrot.lane.b32.xlu0 %v923_v21, %s1032_s12 }
 0x1fd   : > { %753 = vrot.lane.b32.xlu1 %v923_v21, %s1031_s15  ;;  %721 = vrot.lane.b32.xlu0 %v921_v20, %s1031_s15 }
 0x243   : > { %v670_v22 = vpop.permute.xlu1 %669  ;;  %v662_v23 = vpop.permute.xlu0 %661 }
 0x244   : > { %664 = vst.msk [vmem:[%s1202_s10 + $0x4] sm:$0xf] %vm639_vm2, %v662_v23 }
 0x247   : > { %v652_v24 = vpop.permute.xlu0 %651  ;;  %v694_v25 = vpop.permute.xlu1 %693 }
 0x248   : > { %696 = vst.msk [vmem:[%s1202_s10 + $0xc] sm:$0xf] %vm639_vm2, %v694_v25 }
 0x24b   : > { %v726_v26 = vpop.permute.xlu0 %725  ;;  %v702_v27 = vpop.permute.xlu1 %701 }
 0x24c   : > { %728 = vst.msk [vmem:[%s1202_s10 + $0x14] sm:$0xf] %vm639_vm2, %v726_v26 }
 0x24f   : > { %v686_v28 = vpop.permute.xlu0 %685  ;;  %v734_v29 = vpop.permute.xlu1 %733 }
 0x253   : > { %v718_v30 = vpop.permute.xlu0 %717  ;;  %v758_v31 = vpop.permute.xlu1 %757 }
 0x254   : > { %760 = vst.msk [vmem:[%s1202_s10 + $0x1c] sm:$0xf] %vm639_vm2, %v758_v31 }
 0x257   : > { %v666_v32 = vpop.permute.xlu1 %665  ;;  %v645_v33 = vpop.permute.xlu0 %644 }
 0x258   : > { %668 = vst.msk [vmem:[%s1202_s10 + $0x4] sm:$0xf] %vm647_vm3, %v666_v32  ;;  %648 = vst.msk [vmem:[%s1202_s10] sm:$0xf] %vm647_vm3, %v645_v33 }
 0x259   : > { %672 = vst.msk [vmem:[%s1202_s10 + $0x4] sm:$0xf] %vm654_vm4, %v670_v22  ;;  %655 = vst.msk [vmem:[%s1202_s10] sm:$0xf] %vm654_vm4, %v652_v24 }
 0x25a   : > { %674 = vst.msk [vmem:[%s1202_s10 + $0x4] sm:$0xf] %vm659_vm5, %v917_v18 }
 0x25b   : > { %v766_v34 = vpop.permute.xlu1 %765  ;;  %v750_v35 = vpop.permute.xlu0 %749 }
 0x25f   : > { %v657_v36 = vpop.permute.xlu0 %656  ;;  %v698_v37 = vpop.permute.xlu1 %697 }
 0x260   : > { %660 = vst.msk [vmem:[%s1202_s10] sm:$0xf] %vm659_vm5, %v657_v36 }
 0x261   : > { %700 = vst.msk [vmem:[%s1202_s10 + $0xc] sm:$0xf] %vm647_vm3, %v698_v37 }
 0x262   : > { %704 = vst.msk [vmem:[%s1202_s10 + $0xc] sm:$0xf] %vm654_vm4, %v702_v27 }
 0x263   : > { %706 = vst.msk [vmem:[%s1202_s10 + $0xc] sm:$0xf] %vm659_vm5, %v919_v19  ;;  %v730_v38 = vpop.permute.xlu1 %729  ;;  %v680_v39 = vpop.permute.xlu0 %679 }
 0x264   : > { %732 = vst.msk [vmem:[%s1202_s10 + $0x14] sm:$0xf] %vm647_vm3, %v730_v38  ;;  %682 = vst.msk [vmem:[%s1202_s10 + $0x8] sm:$0xf] %vm647_vm3, %v680_v39 }
 0x265   : > { %736 = vst.msk [vmem:[%s1202_s10 + $0x14] sm:$0xf] %vm654_vm4, %v734_v29  ;;  %688 = vst.msk [vmem:[%s1202_s10 + $0x8] sm:$0xf] %vm654_vm4, %v686_v28 }
 0x266   : > { %738 = vst.msk [vmem:[%s1202_s10 + $0x14] sm:$0xf] %vm659_vm5, %v921_v20 }
 0x267   : > { %v690_v40 = vpop.permute.xlu1 %689  ;;  %v712_v41 = vpop.permute.xlu0 %711 }
 0x268   : > { %692 = vst.msk [vmem:[%s1202_s10 + $0x8] sm:$0xf] %vm659_vm5, %v690_v40 }
 0x269   : > { %714 = vst.msk [vmem:[%s1202_s10 + $0x10] sm:$0xf] %vm647_vm3, %v712_v41 }
 0x26a   : > { %720 = vst.msk [vmem:[%s1202_s10 + $0x10] sm:$0xf] %vm654_vm4, %v718_v30 }
 0x26b   : > { %v762_v42 = vpop.permute.xlu1 %761  ;;  %v744_v43 = vpop.permute.xlu0 %743 }
 0x26c   : > { %764 = vst.msk [vmem:[%s1202_s10 + $0x1c] sm:$0xf] %vm647_vm3, %v762_v42  ;;  %746 = vst.msk [vmem:[%s1202_s10 + $0x18] sm:$0xf] %vm647_vm3, %v744_v43 }
 0x26d   : > { %768 = vst.msk [vmem:[%s1202_s10 + $0x1c] sm:$0xf] %vm654_vm4, %v766_v34  ;;  %752 = vst.msk [vmem:[%s1202_s10 + $0x18] sm:$0xf] %vm654_vm4, %v750_v35 }
 0x26e   : > { %770 = vst.msk [vmem:[%s1202_s10 + $0x1c] sm:$0xf] %vm659_vm5, %v923_v21 }
 0x26f   : > { %v754_v44 = vpop.permute.xlu1 %753  ;;  %v722_v45 = vpop.permute.xlu0 %721 }
 0x270   : > { %756 = vst.msk [vmem:[%s1202_s10 + $0x18] sm:$0xf] %vm659_vm5, %v754_v44  ;;  %724 = vst.msk [vmem:[%s1202_s10 + $0x10] sm:$0xf] %vm659_vm5, %v722_v45 }
 0x271 PF: > { %s14_s17 = sadd.s32 1, %s1027_s17   ;;  %s1298_s15 = smov %s1023_s16 }
 0x272   : > { %p11_p5 = scmp.ge.s32.totalorder %s14_s17, 4   ;;  %s1299_s16 = smov %s1301_s18 }
 0x274   :  { %13 = sbr.rel (!%p11_p5) target bundleno = 2 (0x2), region = 66 }

</bundles_post_ra>
